<compile_context>
chip_gen: v6e
topology: v6e:2x2x1
jax: 0.10.0
libtpu: 0.0.40
codegen_flags: <defaults>
</compile_context>

<pallas_src>
import functools

import jax
import jax.numpy as jnp
from jax.experimental import pallas as pl
from jax.experimental.pallas import tpu as pltpu


def _round_up(v, m):
    return ((v + m - 1) // m) * m


def _sublane_multiple(dtype):
    itemsize = jnp.dtype(dtype).itemsize
    if itemsize >= 4:
        return 8
    if itemsize == 2:
        return 16
    return 32


def _tile_defaults():
    """(tile_m, tile_n, vmem_limit_bytes) chosen per TPU generation."""
    try:
        kind = jax.devices()[0].device_kind.lower()
    except Exception:  # pragma: no cover - CPU/interpret fallback
        kind = ""
    if ("v5" in kind) or ("v4" in kind) or ("v3" in kind) or ("v2" in kind):
        # Conservative: 2 MiB f32 tiles -> 8 MiB double-buffered, safely under
        # the 16 MiB default scoped-VMEM limit on older generations.
        return 512, 1024, None
    # v6e / v7x: ~4 MiB f32 tiles halve the 0.35 us per-step overhead at
    # >=1.4 TB/s HBM.  2 arrays x 2 bufs x 4 MiB = 16 MiB; ask for 32 MiB.
    return 1024, 1024, 32 * 1024 * 1024


def _largest_lane_divisor(size, max_cols):
    """Largest multiple of 128 that divides `size` and is <= max_cols (0 if none)."""
    best = 0
    c = 128
    limit = min(size, max_cols)
    while c <= limit:
        if size % c == 0:
            best = c
        c += 128
    return best


def _quadratic_kernel(coef_ref, x_ref, o_ref):
    # coef_ref: SMEM (3,) float32 scalar-prefetch -> [a, b, c]
    a = coef_ref[0]
    b = coef_ref[1]
    c = coef_ref[2]
    x = x_ref[...]
    # Horner form: one fewer VPU mul than a*x*x + b*x + c; fully hidden under DMA.
    o_ref[...] = ((a * x + b) * x + c).astype(o_ref.dtype)


def _quadratic_ref(x, a, b, c):
    """Fused-XLA fallback / reference (same f32 Horner math as the kernel)."""
    af = jnp.asarray(a, jnp.float32)
    bf = jnp.asarray(b, jnp.float32)
    cf = jnp.asarray(c, jnp.float32)
    return ((af * x + bf) * x + cf).astype(x.dtype)


@functools.partial(
    jax.jit,
    static_argnames=("tile_m", "tile_n", "min_pallas_size", "donate_x"),
)
def quadratic_forward(x, a, b, c, *, tile_m=None, tile_n=None,
                      min_pallas_size=65536, donate_x=False):
    """Compute a*x**2 + b*x + c elementwise with a Pallas TPU kernel.

    Float inputs only (bf16 is computed in f32 and cast back).  Tiny or
    ragged-sized inputs are routed to XLA's fused elementwise, which already
    sits at the same HBM roofline for this op.
    """
    orig_shape = x.shape
    size = x.size
    if size == 0:
        return x

    def_tm, def_tn, vmem_limit = _tile_defaults()
    tm_target = tile_m if tile_m is not None else def_tm
    tn_target = tile_n if tile_n is not None else def_tn

    # Tiny inputs: pallas_call launch overhead dominates -> fused XLA wins.
    if size < min_pallas_size:
        return _quadratic_ref(x, a, b, c)

    cols = _largest_lane_divisor(size, tn_target)
    if cols == 0:
        # Ragged size: padding through Pallas would cost ~3x the HBM bytes of
        # XLA's fused elementwise, so stay in plain JAX.
        # TODO(synk): run Pallas on the divisible prefix + jnp tail if ragged
        # sizes ever dominate.
        return _quadratic_ref(x, a, b, c)

    rows = size // cols
    sub = _sublane_multiple(x.dtype)

    # Keep tile byte-size near the target even when cols < tn_target.
    tm = tm_target * max(1, tn_target // cols)
    # Megacore (v7x): ensure the row axis splits into >= 2 tiles when it can,
    # so both TensorCores get work on the ("parallel", "parallel") grid.
    if rows >= 2 * sub:
        tm = min(tm, _round_up(pl.cdiv(rows, 2), sub))
    tm = min(tm, _round_up(rows, sub))
    if tm > rows:
        tm = rows          # block == full (small) row extent -> legal layout
    tn = cols              # full lane extent of the slab, multiple of 128

    x2 = x.reshape(rows, cols)          # contiguous reshape: zero-copy under jit
    coef = jnp.stack([jnp.asarray(a, jnp.float32),
                      jnp.asarray(b, jnp.float32),
                      jnp.asarray(c, jnp.float32)])

    grid = (pl.cdiv(rows, tm), pl.cdiv(cols, tn))

    cp_kwargs = dict(dimension_semantics=("parallel", "parallel"))
    if vmem_limit is not None:
        cp_kwargs["vmem_limit_bytes"] = vmem_limit

    y2 = pl.pallas_call(
        _quadratic_kernel,
        out_shape=jax.ShapeDtypeStruct((rows, cols), x.dtype),
        grid_spec=pltpu.PrefetchScalarGridSpec(
            num_scalar_prefetch=1,              # coef -> SMEM before the grid
            grid=grid,
            in_specs=[pl.BlockSpec((tm, tn), lambda i, j, coef: (i, j))],
            out_specs=pl.BlockSpec((tm, tn), lambda i, j, coef: (i, j)),
        ),
        compiler_params=pltpu.CompilerParams(**cp_kwargs),
        input_output_aliases=({1: 0} if donate_x else {}),
    )(coef, x2)

    return y2.reshape(orig_shape)


if __name__ == "__main__":
    # Deterministic parameters matching QuadraticModel.__init__
    a = jnp.float32(0.7)
    b = jnp.float32(0.3)
    c = jnp.float32(0.3)

    key = jax.random.PRNGKey(0)
    k1, k2, k3 = jax.random.split(key, 3)

    # Small input consistent with the module's elementwise forward; force the
    # Pallas path (the default wrapper would route such a tiny tensor to XLA).
    x = jax.random.normal(k1, (2, 4, 16, 16), dtype=jnp.float32)
    y = jax.block_until_ready(quadratic_forward(x, a, b, c, min_pallas_size=0))
    y_ref = a * x**2 + b * x + c
    assert y.shape == x.shape
    assert jnp.allclose(y, y_ref, atol=1e-5, rtol=1e-5)

    # Larger input: exercises the zero-copy, multi-row-tile (megacore) grid.
    xl = jax.random.normal(k2, (64, 4, 32, 32), dtype=jnp.float32)
    yl = jax.block_until_ready(quadratic_forward(xl, a, b, c))
    assert jnp.allclose(yl, a * xl**2 + b * xl + c, atol=1e-5, rtol=1e-5)

    # bf16 input: exercises dtype-aware sublane tiling (f32 compute, bf16 store).
    xb = xl.astype(jnp.bfloat16)
    yb = jax.block_until_ready(quadratic_forward(xb, a, b, c))
    yb_ref = _quadratic_ref(xb, a, b, c)
    assert jnp.allclose(yb.astype(jnp.float32), yb_ref.astype(jnp.float32),
                        atol=2e-2, rtol=2e-2)

    # Ragged size: routed to the fused-XLA fallback (still correct).
    xr = jax.random.normal(k3, (3, 5, 7), dtype=jnp.float32)
    yr = jax.block_until_ready(quadratic_forward(xr, a, b, c))
    assert jnp.allclose(yr, a * xr**2 + b * xr + c, atol=1e-5, rtol=1e-5)

    print("KERNEL_OK")
</pallas_src>

<mosaic_0001>
module attributes {stable_mosaic.version = 11 : i64} {
  func.func @_quadratic_kernel(%arg0: i32, %arg1: i32, %arg2: memref<3xf32, #tpu.memory_space<smem>>, %arg3: memref<2x1024xf32, #tpu.memory_space<vmem>>, %arg4: memref<2x1024xf32, #tpu.memory_space<vmem>>) attributes {dimension_semantics = [#tpu.dimension_semantics<parallel>, #tpu.dimension_semantics<parallel>], iteration_bounds = array<i64: 1, 1>, scalar_prefetch = 1 : i64, scratch_operands = 0 : i64, tpu.core_type = #tpu.core_type<tc>, window_params = [{transform_indices = @transform_0, window_bounds = array<i64: 2, 1024>}, {transform_indices = @transform_1, window_bounds = array<i64: 2, 1024>}]} {
    %c0 = arith.constant 0 : index
    %0 = memref.load %arg2[%c0] : memref<3xf32, #tpu.memory_space<smem>>
    %c1 = arith.constant 1 : index
    %1 = memref.load %arg2[%c1] : memref<3xf32, #tpu.memory_space<smem>>
    %c2 = arith.constant 2 : index
    %2 = memref.load %arg2[%c2] : memref<3xf32, #tpu.memory_space<smem>>
    %c0_0 = arith.constant 0 : index
    %c0_1 = arith.constant 0 : index
    %3 = vector.load %arg3[%c0_0, %c0_1] : memref<2x1024xf32, #tpu.memory_space<vmem>>, vector<2x1024xf32>
    %4 = vector.broadcast %0 : f32 to vector<2x1024xf32>
    %5 = arith.mulf %4, %3 : vector<2x1024xf32>
    %6 = vector.broadcast %1 : f32 to vector<2x1024xf32>
    %7 = arith.addf %5, %6 : vector<2x1024xf32>
    %8 = arith.mulf %7, %3 : vector<2x1024xf32>
    %9 = vector.broadcast %2 : f32 to vector<2x1024xf32>
    %10 = arith.addf %8, %9 : vector<2x1024xf32>
    %c0_2 = arith.constant 0 : index
    %c0_3 = arith.constant 0 : index
    %11 = vector.load %arg4[%c0_2, %c0_3] : memref<2x1024xf32, #tpu.memory_space<vmem>>, vector<2x1024xf32>
    tpu.vector_store %arg4[%c0_2, %c0_3], %10 {strides = array<i32>} : memref<2x1024xf32, #tpu.memory_space<vmem>>, vector<2x1024xf32>,
    return
  }
  func.func @transform_0(%arg0: i32, %arg1: i32, %arg2: memref<3xf32, #tpu.memory_space<smem>>) -> (i32, i32) {
    %c0_i32 = arith.constant 0 : i32
    return %arg0, %arg1 : i32, i32
  }
  func.func @transform_1(%arg0: i32, %arg1: i32, %arg2: memref<3xf32, #tpu.memory_space<smem>>) -> (i32, i32) {
    %c0_i32 = arith.constant 0 : i32
    return %arg0, %arg1 : i32, i32
  }
}

</mosaic_0001>

<bundles_post_ra>
// kernel: quadratic_forward.1
= control target key start
LH: loop header
LB: loop body
LE: loop exit
PB: predicated region body
PF: predicated region fallthrough
CT: control target
= control target key end

     0   :  { %s85_s0 = inlined_call_operand.vmem [shape: f32[3], index: 0, kind: input, shape index: {}]   ;;  %s86_s1 = inlined_call_operand.vmem [shape: f32[2,1024], index: 1, kind: input, shape index: {}]   ;;  %s87_s2 = inlined_call_operand.vmem [shape: f32[2,1024], index: 2, kind: output, shape index: {}]  }
   0x1   :  { %s7_s11 = sshll.u32 %s85_s0, 4  ;;  %s8_s11 = int_to_ptr.vmem [resolvable:$true] %s7_s11 }
   0x2   :  { %s40_s12 = scalar_lea.vmem %s8_s11, 16  ;;  %p45_p1 = scmp.lt.s32.totalorder %s8_s11, %s8_s11 }
   0x3   :  { %p41_p0 = scmp.ne.s32.totalorder %s8_s11, %s40_s12  ;;  %p46_p2 = scmp.lt.s32.totalorder %s40_s12, %s40_s12 }
   0x5   :  { %p47_p3 = por %p46_p2, %p45_p1 }
   0x7   :  { %p48_p4 = pnand %p47_p3, %p41_p0 }
   0x9   :  { %51 = shalt.err (!%p48_p4)  }
   0xa   :  { %s54_s13 = smov [#allocation3]  }
   0xb   :  { %10 = dma.vmem_to_smem %s8_s11, 16, %s54_s13, [#allocation2] }
   0xc   :  { %52 = dma.done.wait [#allocation2], 16 }
   0xd   :  { %53 = vsyncadd [#allocation2], 4294967280 }
   0xe   :  { %12 = sfence }
   0xf   :  { %s15_s14 = sld [smem:[#allocation3]]  ;;  %v18_v0 = vld [vmem:[%s86_s1] sm:$0xff]  ;;  %v19_v1 = vld [vmem:[%s86_s1 + $0x8] sm:$0xff] }
  0x10   :  { %s37_s15 = sld [smem:[#allocation3 + $0x1]] }
  0x11   :  { %s38_s16 = sld [smem:[#allocation3 + $0x2]] }
  0x15   :  { %v20_v2 = vstv %s15_s14 }
  0x16   :  { %v21_v3 = vmul.f32 %v20_v2, %v18_v0  ;;  %v23_v4 = vstv %s37_s15  ;;  %v22_v5 = vmul.f32 %v20_v2, %v19_v1 }
  0x17   :  { %v28_v8 = vstv %s38_s16 }
  0x18   :  { %v24_v6 = vadd.f32 %v23_v4, %v21_v3  ;;  %v25_v7 = vadd.f32 %v23_v4, %v22_v5 }
  0x1a   :  { %v26_v9 = vmul.f32 %v24_v6, %v18_v0  ;;  %v27_v10 = vmul.f32 %v25_v7, %v19_v1 }
  0x1c   :  { %v29_v11 = vadd.f32 %v28_v8, %v26_v9  ;;  %v30_v12 = vadd.f32 %v28_v8, %v27_v10 }
  0x1e   :  { %31 = vst [vmem:[%s87_s2] sm:$0xff] %v29_v11  ;;  %32 = vst [vmem:[%s87_s2 + $0x8] sm:$0xff] %v30_v12 }

</bundles_post_ra>
